<compile_context>
chip_gen: v7x
topology: tpu7x:2x2x1
jax: 0.10.0
libtpu: 0.0.40
codegen_flags: <defaults>
</compile_context>

<pallas_src>
import functools
import math

import jax
import jax.numpy as jnp
from jax import lax
from jax.experimental import pallas as pl
from jax.experimental.pallas import tpu as pltpu

NEG_INF = -1e9  # same additive mask value the module is normally called with


def _default_vmem_limit():
    """~85% of physical VMEM, capped at 110 MiB (v5e/v6e ~108 MiB, v7x ~54 MiB)."""
    try:
        cap = int(pltpu.get_tpu_info().vmem_capacity_bytes)
    except Exception:
        cap = 64 * 1024 * 1024
    return int(min(cap * 0.85, 110 * 1024 * 1024))


# ----------------------- Stage 1: QKV projection + RoPE --------------------- #

def _qkv_rope_proj_kernel(x_ref, wq_ref, wkv_ref, cos_ref, sin_ref,
                          q_ref, k_ref, v_ref, *, nq, nkv, d, scale):
    """Per (batch, seq-tile): q = RoPE(x Wq^T)/sqrt(d), k = RoPE(x Wk^T), v = x Wv^T.

    Views: x (1, ts, H) bf16; wq (H, H) bf16; wkv (2*nkv*d, H) bf16 (fused K|V rows);
           cos/sin (1, ts, d) f32; q_out (1, nq, ts, d) bf16; k/v_out (1, nkv, ts, d) bf16.
    """
    half = d // 2

    def rope(t, c, s):  # t, c, s: (ts, d) f32
        rot = jnp.concatenate([-t[:, half:], t[:, :half]], axis=-1)
        return t * c + rot * s

    def linear(x_b, w_b):  # PyTorch (out, in) weights: contract last dims, no .T
        return lax.dot_general(x_b, w_b, (((1,), (1,)), ((), ())),
                               preferred_element_type=jnp.float32)

    x = x_ref[0]
    cos = cos_ref[0]
    sin = sin_ref[0]
    q = linear(x, wq_ref[...])          # (ts, nq*d)  f32
    kv = linear(x, wkv_ref[...])        # (ts, 2*nkv*d) f32 -- single fused matmul

    for h in range(nq):                 # 1/sqrt(d) folded into q once per token
        qh = rope(q[:, h * d:(h + 1) * d], cos, sin) * scale
        q_ref[0, h] = qh.astype(q_ref.dtype)
    for g in range(nkv):
        kh = rope(kv[:, g * d:(g + 1) * d], cos, sin)
        k_ref[0, g] = kh.astype(k_ref.dtype)
        vh = kv[:, (nkv + g) * d:(nkv + g + 1) * d]
        v_ref[0, g] = vh.astype(v_ref.dtype)


# ----------------------- Stage 2: flash attention core ---------------------- #

def _flash_attn_kernel(q_ref, k_ref, v_ref, o_ref, m_scr, l_scr, acc_scr,
                       *, nq, nkv, d, tq, tk):
    """One (batch, q-tile, kv-tile) step. No weights in VMEM.

    Views: q (1, nq, tq, d) bf16 (pre-scaled, RoPE'd); k/v (1, nkv, tk, d) bf16;
           o (1, nq, tq, d) bf16; scratch m/l (nq*tq, 1) f32; acc (nq*tq, d) f32.
    """
    qi = pl.program_id(1)
    kj = pl.program_id(2)
    group = nq // nkv

    @pl.when(kj == 0)
    def _init():
        m_scr[...] = jnp.full(m_scr.shape, -jnp.inf, dtype=jnp.float32)
        l_scr[...] = jnp.zeros(l_scr.shape, dtype=jnp.float32)
        acc_scr[...] = jnp.zeros(acc_scr.shape, dtype=jnp.float32)

    q_start = qi * tq
    k_start = kj * tk
    live = k_start <= q_start + (tq - 1)        # tile has at least one unmasked entry
    diag = k_start + (tk - 1) > q_start         # tile straddles the causal diagonal

    def attend(masked):
        if masked:
            # Causal mask only for diagonal tiles; no int modulo (iota over (group,tq,tk)).
            row = lax.broadcasted_iota(jnp.int32, (group, tq, tk), 1)
            col = lax.broadcasted_iota(jnp.int32, (group, tq, tk), 2)
            mask = jnp.where(k_start + col <= q_start + row, 0.0, NEG_INF)
            mask = mask.astype(jnp.float32).reshape(group * tq, tk)
        for g in range(nkv):
            # Stack the `group` query heads of KV head g along rows -> one big matmul.
            q_g = q_ref[0, g * group:(g + 1) * group].reshape(group * tq, d)  # bf16
            k_g = k_ref[0, g]                                                 # (tk, d)
            v_g = v_ref[0, g]                                                 # (tk, d)
            s = lax.dot_general(q_g, k_g, (((1,), (1,)), ((), ())),
                                preferred_element_type=jnp.float32)           # (group*tq, tk)
            if masked:
                s = s + mask
            r0, r1 = g * group * tq, (g + 1) * group * tq
            m_prev = m_scr[r0:r1, :]
            m_new = jnp.maximum(m_prev, jnp.max(s, axis=-1, keepdims=True))
            alpha = jnp.exp(m_prev - m_new)
            p = jnp.exp(s - m_new)
            l_scr[r0:r1, :] = alpha * l_scr[r0:r1, :] + jnp.sum(p, axis=-1, keepdims=True)
            acc_scr[r0:r1, :] = alpha * acc_scr[r0:r1, :] + lax.dot_general(
                p.astype(jnp.bfloat16), v_g, (((1,), (0,)), ((), ())),
                preferred_element_type=jnp.float32)
            m_scr[r0:r1, :] = m_new

    @pl.when(jnp.logical_and(live, diag))
    def _diag_tile():
        attend(True)

    @pl.when(jnp.logical_and(live, jnp.logical_not(diag)))
    def _full_tile():                   # fully below the diagonal: no mask needed
        attend(False)

    @pl.when(kj == pl.num_programs(2) - 1)
    def _finalize():
        inv_l = pl.reciprocal(l_scr[...], approx=True)    # EUP slot
        outn = acc_scr[...] * inv_l
        for h in range(nq):             # head-major bf16 output, no concat/re-interleave
            o_ref[0, h] = outn[h * tq:(h + 1) * tq, :].astype(o_ref.dtype)


# ----------------------- Stage 3: output projection ------------------------- #

def _o_proj_kernel(attn_ref, wo_ref, o_ref, *, nq, d):
    """out[:, n-tile] = sum_h attn_h @ Wo[n-tile, h*d:(h+1)*d]^T (per-head accumulation).

    Views: attn (1, nq, ts, d) bf16; wo (tn, H) bf16; o (1, ts, tn) out-dtype.
    """
    acc = None
    for h in range(nq):
        part = lax.dot_general(attn_ref[0, h], wo_ref[:, h * d:(h + 1) * d],
                               (((1,), (1,)), ((), ())),
                               preferred_element_type=jnp.float32)
        acc = part if acc is None else acc + part
    o_ref[0] = acc.astype(o_ref.dtype)


# ------------------------------- Wrapper ------------------------------------ #

def fused_attention(x, wq, wkv, wo, cos, sin, *,
                    num_q_heads, num_kv_heads, head_dim,
                    block_q=256, block_kv=256, block_proj=256, block_out=2048,
                    vmem_limit_bytes=None):
    """x: (B, S, H). wq/wo: (H, H); wkv: (2*nkv*d, H) (fused kv_proj_weight), all
    PyTorch (out, in) layout. cos/sin: (B, S, head_dim). Causal mask is generated
    inside the attention kernel."""
    B, S, H = x.shape
    nq, nkv, d = num_q_heads, num_kv_heads, head_dim
    assert H == nq * d
    assert nq % nkv == 0
    assert wq.shape == (H, H) and wo.shape == (H, H)
    assert wkv.shape == (2 * nkv * d, H)

    tq = min(block_q, S)
    tk = min(block_kv, S)
    ts = min(block_proj, S)
    tn = min(block_out, H)
    assert S % tq == 0 and S % tk == 0 and S % ts == 0 and H % tn == 0
    for t in (tq, tk, ts):
        assert t % 8 == 0 or t == S

    if vmem_limit_bytes is None:
        vmem_limit_bytes = _default_vmem_limit()

    # bf16 MXU inputs; f32 accumulation / RoPE / softmax inside the kernels.
    xb = x.astype(jnp.bfloat16)
    wqb = wq.astype(jnp.bfloat16)
    wkvb = wkv.astype(jnp.bfloat16)
    wob = wo.astype(jnp.bfloat16)
    cosf = cos.astype(jnp.float32)
    sinf = sin.astype(jnp.float32)
    scale = 1.0 / math.sqrt(d)

    # ---- Stage 1: Q/K/V projection + RoPE, once per token (not per q-tile). ----
    qh, kh, vh = pl.pallas_call(
        functools.partial(_qkv_rope_proj_kernel, nq=nq, nkv=nkv, d=d, scale=scale),
        out_shape=(jax.ShapeDtypeStruct((B, nq, S, d), jnp.bfloat16),
                   jax.ShapeDtypeStruct((B, nkv, S, d), jnp.bfloat16),
                   jax.ShapeDtypeStruct((B, nkv, S, d), jnp.bfloat16)),
        grid=(B, S // ts),
        in_specs=[
            pl.BlockSpec((1, ts, H), lambda b, i: (b, i, 0)),            # x
            pl.BlockSpec((H, H), lambda b, i: (0, 0)),                   # Wq
            pl.BlockSpec((2 * nkv * d, H), lambda b, i: (0, 0)),         # fused Wkv
            pl.BlockSpec((1, ts, d), lambda b, i: (b, i, 0)),            # cos
            pl.BlockSpec((1, ts, d), lambda b, i: (b, i, 0)),            # sin
        ],
        out_specs=[
            pl.BlockSpec((1, nq, ts, d), lambda b, i: (b, 0, i, 0)),     # q (head-major)
            pl.BlockSpec((1, nkv, ts, d), lambda b, i: (b, 0, i, 0)),    # k (head-major)
            pl.BlockSpec((1, nkv, ts, d), lambda b, i: (b, 0, i, 0)),    # v (head-major)
        ],
        compiler_params=pltpu.CompilerParams(
            dimension_semantics=("parallel", "parallel"),
            vmem_limit_bytes=vmem_limit_bytes),
    )(xb, wqb, wkvb, cosf, sinf)

    # ---- Stage 2: flash attention core (no resident weights). ----
    attn = pl.pallas_call(
        functools.partial(_flash_attn_kernel, nq=nq, nkv=nkv, d=d, tq=tq, tk=tk),
        out_shape=jax.ShapeDtypeStruct((B, nq, S, d), jnp.bfloat16),
        grid=(B, S // tq, S // tk),
        in_specs=[
            pl.BlockSpec((1, nq, tq, d), lambda b, i, j: (b, 0, i, 0)),
            pl.BlockSpec((1, nkv, tk, d), lambda b, i, j: (b, 0, j, 0)),
            pl.BlockSpec((1, nkv, tk, d), lambda b, i, j: (b, 0, j, 0)),
        ],
        out_specs=pl.BlockSpec((1, nq, tq, d), lambda b, i, j: (b, 0, i, 0)),
        scratch_shapes=[
            pltpu.VMEM((nq * tq, 1), jnp.float32),   # running max
            pltpu.VMEM((nq * tq, 1), jnp.float32),   # running sum
            pltpu.VMEM((nq * tq, d), jnp.float32),   # output accumulator
        ],
        compiler_params=pltpu.CompilerParams(
            dimension_semantics=("parallel", "parallel", "arbitrary"),
            vmem_limit_bytes=vmem_limit_bytes),
    )(qh, kh, vh)

    # ---- Stage 3: output projection with Wo streamed in (tn, H) tiles. ----
    out = pl.pallas_call(
        functools.partial(_o_proj_kernel, nq=nq, d=d),
        out_shape=jax.ShapeDtypeStruct((B, S, H), x.dtype),
        grid=(B, S // ts, H // tn),
        in_specs=[
            pl.BlockSpec((1, nq, ts, d), lambda b, i, n: (b, 0, i, 0)),  # attn (head-major)
            pl.BlockSpec((tn, H), lambda b, i, n: (n, 0)),               # Wo row tile
        ],
        out_specs=pl.BlockSpec((1, ts, tn), lambda b, i, n: (b, i, n)),
        compiler_params=pltpu.CompilerParams(
            dimension_semantics=("parallel", "parallel", "parallel"),
            vmem_limit_bytes=vmem_limit_bytes),
    )(attn, wob)
    return out


# -------------------------- Pure-JAX reference ------------------------------ #

def _rotate_half(t):
    half = t.shape[-1] // 2
    return jnp.concatenate([-t[..., half:], t[..., :half]], axis=-1)


def fused_attention_ref(x, wq, wkv, wo, cos, sin, mask,
                        *, num_q_heads, num_kv_heads, head_dim):
    B, S, H = x.shape
    wk, wv = jnp.split(wkv, 2, axis=0)
    q = jnp.einsum('bsh,oh->bso', x, wq).reshape(B, S, num_q_heads, head_dim)
    k = jnp.einsum('bsh,oh->bso', x, wk).reshape(B, S, num_kv_heads, head_dim)
    v = jnp.einsum('bsh,oh->bso', x, wv).reshape(B, S, num_kv_heads, head_dim)
    c = cos[:, :, None, :]
    s = sin[:, :, None, :]
    q = q * c + _rotate_half(q) * s
    k = k * c + _rotate_half(k) * s
    q = q.transpose(0, 2, 1, 3)
    k = k.transpose(0, 2, 1, 3)
    v = v.transpose(0, 2, 1, 3)
    group = num_q_heads // num_kv_heads
    scale = 1.0 / (head_dim ** 0.5)
    outs = []
    for h in range(num_q_heads):
        kv = h // group
        scores = jnp.einsum('bqd,bkd->bqk', q[:, h], k[:, kv]) * scale + mask
        probs = jax.nn.softmax(scores, axis=-1)
        outs.append(jnp.einsum('bqk,bkd->bqd', probs, v[:, kv]))
    out = jnp.stack(outs, axis=1).transpose(0, 2, 1, 3).reshape(B, S, H)
    return jnp.einsum('bsh,oh->bso', out, wo)


# --------------------------------- Main ------------------------------------- #

if __name__ == "__main__":
    B, S = 2, 8
    num_q_heads, num_kv_heads, head_dim = 4, 2, 8
    H = num_q_heads * head_dim  # hidden_size = 32

    key = jax.random.PRNGKey(0)
    kx, kq, kkv, ko = jax.random.split(key, 4)

    x = jax.random.normal(kx, (B, S, H), dtype=jnp.float32)

    # Deterministic "checkpoint": normal(0, 0.02), mirroring _init_weights.
    wq = 0.02 * jax.random.normal(kq, (H, H), dtype=jnp.float32)
    kv_proj_weight = 0.02 * jax.random.normal(
        kkv, (num_kv_heads * head_dim * 2, H), dtype=jnp.float32)
    wo = 0.02 * jax.random.normal(ko, (H, H), dtype=jnp.float32)

    # Rotary position embeddings (canonical Llama RoPE), broadcast to batch.
    pos = jnp.arange(S, dtype=jnp.float32)
    inv_freq = 1.0 / (10000.0 ** (jnp.arange(0, head_dim, 2, dtype=jnp.float32) / head_dim))
    freqs = pos[:, None] * inv_freq[None, :]                    # (S, d/2)
    emb = jnp.concatenate([freqs, freqs], axis=-1)              # (S, d)
    cos = jnp.broadcast_to(jnp.cos(emb)[None], (B, S, head_dim)).astype(jnp.float32)
    sin = jnp.broadcast_to(jnp.sin(emb)[None], (B, S, head_dim)).astype(jnp.float32)

    out = fused_attention(x, wq, kv_proj_weight, wo, cos, sin,
                          num_q_heads=num_q_heads,
                          num_kv_heads=num_kv_heads,
                          head_dim=head_dim)
    out = jax.block_until_ready(out)

    # Reference uses the equivalent additive causal mask in f32.
    causal = jnp.tril(jnp.ones((S, S), dtype=jnp.bool_))
    mask = jnp.where(causal, 0.0, NEG_INF).astype(jnp.float32)
    mask = jnp.broadcast_to(mask[None], (B, S, S))
    ref = fused_attention_ref(x, wq, kv_proj_weight, wo, cos, sin, mask,
                              num_q_heads=num_q_heads,
                              num_kv_heads=num_kv_heads,
                              head_dim=head_dim)
    ref = jax.block_until_ready(ref)

    assert out.shape == (B, S, H)
    # bf16 MXU inputs / bf16 q,k,v,attn intermediates with f32 accumulation ->
    # tolerance loosened vs pure-f32 reference.
    assert jnp.allclose(out, ref, rtol=5e-2, atol=3e-3), "mismatch vs pure-JAX reference"
    print("KERNEL_OK")
</pallas_src>

<mosaic_0001>
module attributes {stable_mosaic.version = 11 : i64} {
  func.func @_qkv_rope_proj_kernel(%arg0: i32, %arg1: i32, %arg2: memref<1x8x32xbf16, #tpu.memory_space<vmem>>, %arg3: memref<32x32xbf16, #tpu.memory_space<vmem>>, %arg4: memref<32x32xbf16, #tpu.memory_space<vmem>>, %arg5: memref<1x8x8xf32, #tpu.memory_space<vmem>>, %arg6: memref<1x8x8xf32, #tpu.memory_space<vmem>>, %arg7: memref<1x4x8x8xbf16, #tpu.memory_space<vmem>>, %arg8: memref<1x2x8x8xbf16, #tpu.memory_space<vmem>>, %arg9: memref<1x2x8x8xbf16, #tpu.memory_space<vmem>>) attributes {dimension_semantics = [#tpu.dimension_semantics<parallel>, #tpu.dimension_semantics<parallel>], iteration_bounds = array<i64: 2, 1>, scalar_prefetch = 0 : i64, scratch_operands = 0 : i64, tpu.core_type = #tpu.core_type<tc>, window_params = [{transform_indices = @transform_0, window_bounds = array<i64: 1, 8, 32>}, {pipeline_mode = #tpu.pipeline_mode<synchronous>, transform_indices = @transform_1, window_bounds = array<i64: 32, 32>}, {pipeline_mode = #tpu.pipeline_mode<synchronous>, transform_indices = @transform_2, window_bounds = array<i64: 32, 32>}, {transform_indices = @transform_3, window_bounds = array<i64: 1, 8, 8>}, {transform_indices = @transform_4, window_bounds = array<i64: 1, 8, 8>}, {transform_indices = @transform_5, window_bounds = array<i64: 1, 4, 8, 8>}, {transform_indices = @transform_6, window_bounds = array<i64: 1, 2, 8, 8>}, {transform_indices = @transform_7, window_bounds = array<i64: 1, 2, 8, 8>}]} {
    %c0 = arith.constant 0 : index
    %c0_0 = arith.constant 0 : index
    %c0_1 = arith.constant 0 : index
    %0 = vector.load %arg2[%c0, %c0_0, %c0_1] : memref<1x8x32xbf16, #tpu.memory_space<vmem>>, vector<1x8x32xbf16>
    %1 = vector.shape_cast %0 : vector<1x8x32xbf16> to vector<8x32xbf16>
    %c0_2 = arith.constant 0 : index
    %c0_3 = arith.constant 0 : index
    %c0_4 = arith.constant 0 : index
    %2 = vector.load %arg5[%c0_2, %c0_3, %c0_4] : memref<1x8x8xf32, #tpu.memory_space<vmem>>, vector<1x8x8xf32>
    %3 = vector.shape_cast %2 : vector<1x8x8xf32> to vector<8x8xf32>
    %c0_5 = arith.constant 0 : index
    %c0_6 = arith.constant 0 : index
    %c0_7 = arith.constant 0 : index
    %4 = vector.load %arg6[%c0_5, %c0_6, %c0_7] : memref<1x8x8xf32, #tpu.memory_space<vmem>>, vector<1x8x8xf32>
    %5 = vector.shape_cast %4 : vector<1x8x8xf32> to vector<8x8xf32>
    %c0_8 = arith.constant 0 : index
    %c0_9 = arith.constant 0 : index
    %6 = vector.load %arg3[%c0_8, %c0_9] : memref<32x32xbf16, #tpu.memory_space<vmem>>, vector<32x32xbf16>
    %cst = arith.constant dense<0.000000e+00> : vector<8x32xf32>
    %7 = tpu.matmul %1, %6, %cst {dimension_numbers = #tpu.dot_dimension_numbers<[1], [1], [0], [0], [0, 0, 1, 0], [], []>} : vector<8x32xbf16>, vector<32x32xbf16>, vector<8x32xf32> -> vector<8x32xf32>
    %c0_10 = arith.constant 0 : index
    %c0_11 = arith.constant 0 : index
    %8 = vector.load %arg4[%c0_10, %c0_11] : memref<32x32xbf16, #tpu.memory_space<vmem>>, vector<32x32xbf16>
    %cst_12 = arith.constant dense<0.000000e+00> : vector<8x32xf32>
    %9 = tpu.matmul %1, %8, %cst_12 {dimension_numbers = #tpu.dot_dimension_numbers<[1], [1], [0], [0], [0, 0, 1, 0], [], []>} : vector<8x32xbf16>, vector<32x32xbf16>, vector<8x32xf32> -> vector<8x32xf32>
    %10 = vector.extract_strided_slice %7 {offsets = [0, 0], sizes = [8, 8], strides = [1, 1]} : vector<8x32xf32> to vector<8x8xf32>
    %11 = vector.extract_strided_slice %10 {offsets = [0, 4], sizes = [8, 4], strides = [1, 1]} : vector<8x8xf32> to vector<8x4xf32>
    %cst_13 = arith.constant 0.000000e+00 : f32
    %12 = vector.broadcast %cst_13 : f32 to vector<8x4xf32>
    %13 = arith.subf %12, %11 : vector<8x4xf32>
    %14 = vector.extract_strided_slice %10 {offsets = [0, 0], sizes = [8, 4], strides = [1, 1]} : vector<8x8xf32> to vector<8x4xf32>
    %15 = tpu.concatenate %13, %14 in 1 : vector<8x4xf32>, vector<8x4xf32> -> vector<8x8xf32>
    %16 = arith.mulf %10, %3 : vector<8x8xf32>
    %17 = arith.mulf %15, %5 : vector<8x8xf32>
    %18 = arith.addf %16, %17 : vector<8x8xf32>
    %cst_14 = arith.constant 0.353553385 : f32
    %19 = vector.broadcast %cst_14 : f32 to vector<8x8xf32>
    %20 = arith.mulf %18, %19 : vector<8x8xf32>
    %21 = arith.truncf %20 : vector<8x8xf32> to vector<8x8xbf16>
    %c0_15 = arith.constant 0 : index
    %c0_16 = arith.constant 0 : index
    %c0_17 = arith.constant 0 : index
    %c0_18 = arith.constant 0 : index
    %22 = vector.load %arg7[%c0_15, %c0_16, %c0_17, %c0_18] : memref<1x4x8x8xbf16, #tpu.memory_space<vmem>>, vector<1x1x8x8xbf16>
    %23 = vector.shape_cast %22 : vector<1x1x8x8xbf16> to vector<8x8xbf16>
    %24 = vector.shape_cast %21 : vector<8x8xbf16> to vector<1x1x8x8xbf16>
    tpu.vector_store %arg7[%c0_15, %c0_16, %c0_17, %c0_18], %24 {strides = array<i32>} : memref<1x4x8x8xbf16, #tpu.memory_space<vmem>>, vector<1x1x8x8xbf16>,
    %25 = vector.extract_strided_slice %7 {offsets = [0, 8], sizes = [8, 8], strides = [1, 1]} : vector<8x32xf32> to vector<8x8xf32>
    %26 = vector.extract_strided_slice %25 {offsets = [0, 4], sizes = [8, 4], strides = [1, 1]} : vector<8x8xf32> to vector<8x4xf32>
    %cst_19 = arith.constant 0.000000e+00 : f32
    %27 = vector.broadcast %cst_19 : f32 to vector<8x4xf32>
    %28 = arith.subf %27, %26 : vector<8x4xf32>
    %29 = vector.extract_strided_slice %25 {offsets = [0, 0], sizes = [8, 4], strides = [1, 1]} : vector<8x8xf32> to vector<8x4xf32>
    %30 = tpu.concatenate %28, %29 in 1 : vector<8x4xf32>, vector<8x4xf32> -> vector<8x8xf32>
    %31 = arith.mulf %25, %3 : vector<8x8xf32>
    %32 = arith.mulf %30, %5 : vector<8x8xf32>
    %33 = arith.addf %31, %32 : vector<8x8xf32>
    %cst_20 = arith.constant 0.353553385 : f32
    %34 = vector.broadcast %cst_20 : f32 to vector<8x8xf32>
    %35 = arith.mulf %33, %34 : vector<8x8xf32>
    %36 = arith.truncf %35 : vector<8x8xf32> to vector<8x8xbf16>
    %c0_21 = arith.constant 0 : index
    %c1 = arith.constant 1 : index
    %c0_22 = arith.constant 0 : index
    %c0_23 = arith.constant 0 : index
    %37 = vector.load %arg7[%c0_21, %c1, %c0_22, %c0_23] : memref<1x4x8x8xbf16, #tpu.memory_space<vmem>>, vector<1x1x8x8xbf16>
    %38 = vector.shape_cast %37 : vector<1x1x8x8xbf16> to vector<8x8xbf16>
    %39 = vector.shape_cast %36 : vector<8x8xbf16> to vector<1x1x8x8xbf16>
    tpu.vector_store %arg7[%c0_21, %c1, %c0_22, %c0_23], %39 {strides = array<i32>} : memref<1x4x8x8xbf16, #tpu.memory_space<vmem>>, vector<1x1x8x8xbf16>,
    %40 = vector.extract_strided_slice %7 {offsets = [0, 16], sizes = [8, 8], strides = [1, 1]} : vector<8x32xf32> to vector<8x8xf32>
    %41 = vector.extract_strided_slice %40 {offsets = [0, 4], sizes = [8, 4], strides = [1, 1]} : vector<8x8xf32> to vector<8x4xf32>
    %cst_24 = arith.constant 0.000000e+00 : f32
    %42 = vector.broadcast %cst_24 : f32 to vector<8x4xf32>
    %43 = arith.subf %42, %41 : vector<8x4xf32>
    %44 = vector.extract_strided_slice %40 {offsets = [0, 0], sizes = [8, 4], strides = [1, 1]} : vector<8x8xf32> to vector<8x4xf32>
    %45 = tpu.concatenate %43, %44 in 1 : vector<8x4xf32>, vector<8x4xf32> -> vector<8x8xf32>
    %46 = arith.mulf %40, %3 : vector<8x8xf32>
    %47 = arith.mulf %45, %5 : vector<8x8xf32>
    %48 = arith.addf %46, %47 : vector<8x8xf32>
    %cst_25 = arith.constant 0.353553385 : f32
    %49 = vector.broadcast %cst_25 : f32 to vector<8x8xf32>
    %50 = arith.mulf %48, %49 : vector<8x8xf32>
    %51 = arith.truncf %50 : vector<8x8xf32> to vector<8x8xbf16>
    %c0_26 = arith.constant 0 : index
    %c2 = arith.constant 2 : index
    %c0_27 = arith.constant 0 : index
    %c0_28 = arith.constant 0 : index
    %52 = vector.load %arg7[%c0_26, %c2, %c0_27, %c0_28] : memref<1x4x8x8xbf16, #tpu.memory_space<vmem>>, vector<1x1x8x8xbf16>
    %53 = vector.shape_cast %52 : vector<1x1x8x8xbf16> to vector<8x8xbf16>
    %54 = vector.shape_cast %51 : vector<8x8xbf16> to vector<1x1x8x8xbf16>
    tpu.vector_store %arg7[%c0_26, %c2, %c0_27, %c0_28], %54 {strides = array<i32>} : memref<1x4x8x8xbf16, #tpu.memory_space<vmem>>, vector<1x1x8x8xbf16>,
    %55 = vector.extract_strided_slice %7 {offsets = [0, 24], sizes = [8, 8], strides = [1, 1]} : vector<8x32xf32> to vector<8x8xf32>
    %56 = vector.extract_strided_slice %55 {offsets = [0, 4], sizes = [8, 4], strides = [1, 1]} : vector<8x8xf32> to vector<8x4xf32>
    %cst_29 = arith.constant 0.000000e+00 : f32
    %57 = vector.broadcast %cst_29 : f32 to vector<8x4xf32>
    %58 = arith.subf %57, %56 : vector<8x4xf32>
    %59 = vector.extract_strided_slice %55 {offsets = [0, 0], sizes = [8, 4], strides = [1, 1]} : vector<8x8xf32> to vector<8x4xf32>
    %60 = tpu.concatenate %58, %59 in 1 : vector<8x4xf32>, vector<8x4xf32> -> vector<8x8xf32>
    %61 = arith.mulf %55, %3 : vector<8x8xf32>
    %62 = arith.mulf %60, %5 : vector<8x8xf32>
    %63 = arith.addf %61, %62 : vector<8x8xf32>
    %cst_30 = arith.constant 0.353553385 : f32
    %64 = vector.broadcast %cst_30 : f32 to vector<8x8xf32>
    %65 = arith.mulf %63, %64 : vector<8x8xf32>
    %66 = arith.truncf %65 : vector<8x8xf32> to vector<8x8xbf16>
    %c0_31 = arith.constant 0 : index
    %c3 = arith.constant 3 : index
    %c0_32 = arith.constant 0 : index
    %c0_33 = arith.constant 0 : index
    %67 = vector.load %arg7[%c0_31, %c3, %c0_32, %c0_33] : memref<1x4x8x8xbf16, #tpu.memory_space<vmem>>, vector<1x1x8x8xbf16>
    %68 = vector.shape_cast %67 : vector<1x1x8x8xbf16> to vector<8x8xbf16>
    %69 = vector.shape_cast %66 : vector<8x8xbf16> to vector<1x1x8x8xbf16>
    tpu.vector_store %arg7[%c0_31, %c3, %c0_32, %c0_33], %69 {strides = array<i32>} : memref<1x4x8x8xbf16, #tpu.memory_space<vmem>>, vector<1x1x8x8xbf16>,
    %70 = vector.extract_strided_slice %9 {offsets = [0, 0], sizes = [8, 8], strides = [1, 1]} : vector<8x32xf32> to vector<8x8xf32>
    %71 = vector.extract_strided_slice %70 {offsets = [0, 4], sizes = [8, 4], strides = [1, 1]} : vector<8x8xf32> to vector<8x4xf32>
    %cst_34 = arith.constant 0.000000e+00 : f32
    %72 = vector.broadcast %cst_34 : f32 to vector<8x4xf32>
    %73 = arith.subf %72, %71 : vector<8x4xf32>
    %74 = vector.extract_strided_slice %70 {offsets = [0, 0], sizes = [8, 4], strides = [1, 1]} : vector<8x8xf32> to vector<8x4xf32>
    %75 = tpu.concatenate %73, %74 in 1 : vector<8x4xf32>, vector<8x4xf32> -> vector<8x8xf32>
    %76 = arith.mulf %70, %3 : vector<8x8xf32>
    %77 = arith.mulf %75, %5 : vector<8x8xf32>
    %78 = arith.addf %76, %77 : vector<8x8xf32>
    %79 = arith.truncf %78 : vector<8x8xf32> to vector<8x8xbf16>
    %c0_35 = arith.constant 0 : index
    %c0_36 = arith.constant 0 : index
    %c0_37 = arith.constant 0 : index
    %c0_38 = arith.constant 0 : index
    %80 = vector.load %arg8[%c0_35, %c0_36, %c0_37, %c0_38] : memref<1x2x8x8xbf16, #tpu.memory_space<vmem>>, vector<1x1x8x8xbf16>
    %81 = vector.shape_cast %80 : vector<1x1x8x8xbf16> to vector<8x8xbf16>
    %82 = vector.shape_cast %79 : vector<8x8xbf16> to vector<1x1x8x8xbf16>
    tpu.vector_store %arg8[%c0_35, %c0_36, %c0_37, %c0_38], %82 {strides = array<i32>} : memref<1x2x8x8xbf16, #tpu.memory_space<vmem>>, vector<1x1x8x8xbf16>,
    %83 = vector.extract_strided_slice %9 {offsets = [0, 16], sizes = [8, 8], strides = [1, 1]} : vector<8x32xf32> to vector<8x8xf32>
    %84 = arith.truncf %83 : vector<8x8xf32> to vector<8x8xbf16>
    %c0_39 = arith.constant 0 : index
    %c0_40 = arith.constant 0 : index
    %c0_41 = arith.constant 0 : index
    %c0_42 = arith.constant 0 : index
    %85 = vector.load %arg9[%c0_39, %c0_40, %c0_41, %c0_42] : memref<1x2x8x8xbf16, #tpu.memory_space<vmem>>, vector<1x1x8x8xbf16>
    %86 = vector.shape_cast %85 : vector<1x1x8x8xbf16> to vector<8x8xbf16>
    %87 = vector.shape_cast %84 : vector<8x8xbf16> to vector<1x1x8x8xbf16>
    tpu.vector_store %arg9[%c0_39, %c0_40, %c0_41, %c0_42], %87 {strides = array<i32>} : memref<1x2x8x8xbf16, #tpu.memory_space<vmem>>, vector<1x1x8x8xbf16>,
    %88 = vector.extract_strided_slice %9 {offsets = [0, 8], sizes = [8, 8], strides = [1, 1]} : vector<8x32xf32> to vector<8x8xf32>
    %89 = vector.extract_strided_slice %88 {offsets = [0, 4], sizes = [8, 4], strides = [1, 1]} : vector<8x8xf32> to vector<8x4xf32>
    %cst_43 = arith.constant 0.000000e+00 : f32
    %90 = vector.broadcast %cst_43 : f32 to vector<8x4xf32>
    %91 = arith.subf %90, %89 : vector<8x4xf32>
    %92 = vector.extract_strided_slice %88 {offsets = [0, 0], sizes = [8, 4], strides = [1, 1]} : vector<8x8xf32> to vector<8x4xf32>
    %93 = tpu.concatenate %91, %92 in 1 : vector<8x4xf32>, vector<8x4xf32> -> vector<8x8xf32>
    %94 = arith.mulf %88, %3 : vector<8x8xf32>
    %95 = arith.mulf %93, %5 : vector<8x8xf32>
    %96 = arith.addf %94, %95 : vector<8x8xf32>
    %97 = arith.truncf %96 : vector<8x8xf32> to vector<8x8xbf16>
    %c0_44 = arith.constant 0 : index
    %c1_45 = arith.constant 1 : index
    %c0_46 = arith.constant 0 : index
    %c0_47 = arith.constant 0 : index
    %98 = vector.load %arg8[%c0_44, %c1_45, %c0_46, %c0_47] : memref<1x2x8x8xbf16, #tpu.memory_space<vmem>>, vector<1x1x8x8xbf16>
    %99 = vector.shape_cast %98 : vector<1x1x8x8xbf16> to vector<8x8xbf16>
    %100 = vector.shape_cast %97 : vector<8x8xbf16> to vector<1x1x8x8xbf16>
    tpu.vector_store %arg8[%c0_44, %c1_45, %c0_46, %c0_47], %100 {strides = array<i32>} : memref<1x2x8x8xbf16, #tpu.memory_space<vmem>>, vector<1x1x8x8xbf16>,
    %101 = vector.extract_strided_slice %9 {offsets = [0, 24], sizes = [8, 8], strides = [1, 1]} : vector<8x32xf32> to vector<8x8xf32>
    %102 = arith.truncf %101 : vector<8x8xf32> to vector<8x8xbf16>
    %c0_48 = arith.constant 0 : index
    %c1_49 = arith.constant 1 : index
    %c0_50 = arith.constant 0 : index
    %c0_51 = arith.constant 0 : index
    %103 = vector.load %arg9[%c0_48, %c1_49, %c0_50, %c0_51] : memref<1x2x8x8xbf16, #tpu.memory_space<vmem>>, vector<1x1x8x8xbf16>
    %104 = vector.shape_cast %103 : vector<1x1x8x8xbf16> to vector<8x8xbf16>
    %105 = vector.shape_cast %102 : vector<8x8xbf16> to vector<1x1x8x8xbf16>
    tpu.vector_store %arg9[%c0_48, %c1_49, %c0_50, %c0_51], %105 {strides = array<i32>} : memref<1x2x8x8xbf16, #tpu.memory_space<vmem>>, vector<1x1x8x8xbf16>,
    return
  }
  func.func @transform_0(%arg0: i32, %arg1: i32) -> (i32, i32, i32) {
    %c0_i32 = arith.constant 0 : i32
    %c0_i32_0 = arith.constant 0 : i32
    return %arg0, %arg1, %c0_i32 : i32, i32, i32
  }
  func.func @transform_1(%arg0: i32, %arg1: i32) -> (i32, i32) {
    %c0_i32 = arith.constant 0 : i32
    %c0_i32_0 = arith.constant 0 : i32
    %c0_i32_1 = arith.constant 0 : i32
    return %c0_i32, %c0_i32_0 : i32, i32
  }
  func.func @transform_2(%arg0: i32, %arg1: i32) -> (i32, i32) {
    %c0_i32 = arith.constant 0 : i32
    %c0_i32_0 = arith.constant 0 : i32
    %c0_i32_1 = arith.constant 0 : i32
    return %c0_i32, %c0_i32_0 : i32, i32
  }
  func.func @transform_3(%arg0: i32, %arg1: i32) -> (i32, i32, i32) {
    %c0_i32 = arith.constant 0 : i32
    %c0_i32_0 = arith.constant 0 : i32
    return %arg0, %arg1, %c0_i32 : i32, i32, i32
  }
  func.func @transform_4(%arg0: i32, %arg1: i32) -> (i32, i32, i32) {
    %c0_i32 = arith.constant 0 : i32
    %c0_i32_0 = arith.constant 0 : i32
    return %arg0, %arg1, %c0_i32 : i32, i32, i32
  }
  func.func @transform_5(%arg0: i32, %arg1: i32) -> (i32, i32, i32, i32) {
    %c0_i32 = arith.constant 0 : i32
    %c0_i32_0 = arith.constant 0 : i32
    %c0_i32_1 = arith.constant 0 : i32
    return %arg0, %c0_i32, %arg1, %c0_i32_0 : i32, i32, i32, i32
  }
  func.func @transform_6(%arg0: i32, %arg1: i32) -> (i32, i32, i32, i32) {
    %c0_i32 = arith.constant 0 : i32
    %c0_i32_0 = arith.constant 0 : i32
    %c0_i32_1 = arith.constant 0 : i32
    return %arg0, %c0_i32, %arg1, %c0_i32_0 : i32, i32, i32, i32
  }
  func.func @transform_7(%arg0: i32, %arg1: i32) -> (i32, i32, i32, i32) {
    %c0_i32 = arith.constant 0 : i32
    %c0_i32_0 = arith.constant 0 : i32
    %c0_i32_1 = arith.constant 0 : i32
    return %arg0, %c0_i32, %arg1, %c0_i32_0 : i32, i32, i32, i32
  }
}

</mosaic_0001>

<bundles_post_ra>
// kernel: tpu_custom_call.1
= control target key start
LH: loop header
LB: loop body
LE: loop exit
PB: predicated region body
PF: predicated region fallthrough
CT: control target
= control target key end

     0   :  { %s2026_s0 = inlined_call_operand.hbm [shape: bf16[2,8,32], index: 0, kind: input, shape index: {}]   ;;  %s2027_s1 = inlined_call_operand.hbm [shape: bf16[32,32], index: 1, kind: input, shape index: {}]   ;;  %s2028_s2 = inlined_call_operand.hbm [shape: bf16[32,32], index: 2, kind: input, shape index: {}]   ;;  %s2029_s3 = inlined_call_operand.hbm [shape: f32[2,8,8], index: 3, kind: input, shape index: {}]   ;;  %s2030_s4 = inlined_call_operand.hbm [shape: f32[2,8,8], index: 4, kind: input, shape index: {}]   ;;  %s2031_s5 = inlined_call_operand.hbm [shape: bf16[2,4,8,8], index: 5, kind: output, shape index: {0}]   ;;  %s2032_s6 = inlined_call_operand.hbm [shape: bf16[2,2,8,8], index: 6, kind: output, shape index: {1}]   ;;  %s2033_s7 = inlined_call_operand.hbm [shape: bf16[2,2,8,8], index: 7, kind: output, shape index: {2}]  }
   0x1   :  { %2056 = sst [smem:[#allocation26_spill]] %s2027_s1 }
   0x2   :  { %2057 = sst [smem:[#allocation27_spill]] %s2029_s3 }
   0x3   :  { %2058 = sst [smem:[#allocation28_spill]] %s2033_s7 }
   0x4   :  { %13 = vsyncpa [#allocation3], 0 }
   0x5   :  { %15 = vsyncpa [#allocation3 + $0x1], 0 }
   0x6   :  { %16 = vsyncpa [#allocation6], 0 }
   0x7   :  { %17 = vsyncpa [#allocation9], 0 }
   0x8   :  { %19 = vsyncpa [#allocation9 + $0x1], 0 }
   0x9   :  { %20 = vsyncpa [#allocation4], 0 }
   0xa   :  { %22 = vsyncpa [#allocation4 + $0x1], 0 }
   0xb   :  { %23 = vsyncpa [#allocation13], 0 }
   0xc   :  { %25 = vsyncpa [#allocation13 + $0x1], 0  ;;  %s1553_s24 = smov 0   ;;  %s1555_s25 = smov 0  }
   0xd   :  { %s1557_s26 = smov 0   ;;  %s1559_s27 = smov 0  }
   0xe   :  { %s1561_s28 = smov 0   ;;  %s1563_s29 = smov 0  }
   0xf LB: > { %2059 = sst [smem:[#allocation20_spill]] %s1467_s24  ;;  %s1584_s30 = sadd.s32 4294967295, %s1487_s29   ;;  %s1487_s29 = sphi %s1563_s29, %s31_s29   ;;  %s1483_s28 = sphi %s1561_s28, %s2102_s28   ;;  %s1479_s27 = sphi %s1559_s27, %s2101_s27   ;;  %s1475_s26 = sphi %s1557_s26, %s2097_s26   ;;  %s1471_s25 = sphi %s1555_s25, %s2100_s25   ;;  %s1467_s24 = sphi %s1553_s24, %s2099_s24  }
  0x10   : > { %2060 = sst [smem:[#allocation21_spill]] %s1475_s26  ;;  %s2037_s8 = sadd.s32 4294967294, %s1487_s29  }
  0x11   : > { %2061 = sst [smem:[#allocation22_spill]] %s1487_s29  ;;  %p65_p0 = scmp.ne.s32.totalorder %s1471_s25, %s1467_s24 }
  0x12   : > { %p2034_p1 = scmp.eq.s32.totalorder %s1584_s30, 0  ;;  %p195_p3 = scmp.eq.s32.totalorder %s2037_s8, 1 }
  0x13   : > { %p992_p5 = scmp.ge.s32.totalorder %s1487_s29, 1  ;;  %p258_p7 = scmp.lt.s32.totalorder %s1487_s29, 3 }
  0x14   : > { %p1595_p4 = por %p2034_p1, %p65_p0  ;;  %p1600_p6 = por %p195_p3, %p65_p0 }
  0x15   : > { %p1605_p8 = pnand %p992_p5, %p258_p7  ;;  %s1489_s12 = smov [#allocation5]  }
  0x16   : > { %s2062_s9 = scalar_select %p1595_p4, 1, 0 }
  0x17   : > { %s2063_s10 = scalar_select %p1600_p6, 1, 0 }
  0x18   : > { %s2065_s11 = scalar_select %p1605_p8, 1, 0 }
  0x19   : > { %2064 = sst [smem:[#allocation23_spill]] %s2063_s10  ;;  %s270_s13 = sshll.u32 %s1489_s12, 4  ;;  %s271_s13 = int_to_ptr.vmem [resolvable:$true] %s270_s13 }
  0x1a   : > { %p1088_p9 = pneg %p1605_p8  ;;  %s43_s15 = sadd.s32 1, %s1483_s28 }
  0x1b   : > { %s2067_s1 = sld [smem:[#allocation26_spill]] }
  0x1c   : > { %p1614_p11 = pnand %p1088_p9, %p2034_p1 }
  0x1e   : > { %s2066_s14 = scalar_select %p1614_p11, 1, 0 }
  0x1f   : > { %p2046_p13 = pneg %p1614_p11 }
  0x21   : > { %s1191_s18 = scalar_lea.hbm %s2067_s1, 256 }
  0x22   : > { %p1192_p12 = scmp.ne.s32.totalorder %s2067_s1, %s1191_s18  ;;  %p1198_p5 = scmp.lt.u32.totalorder %s1191_s18, %s2067_s1 }
  0x24   : > { %p1194_p0 = pnand %p2046_p13, %p1192_p12 }
  0x26   : > { %p1195_p3 = pneg %p1194_p0 }
  0x28   : > { %p1200_p7 = pnand %p1198_p5, %p1195_p3 }
  0x2a   : > { %1203 = shalt.err (!%p1200_p7)
}
  0x2b   : > { %s1204_s23 = scalar_lea.vmem %s271_s13, 256  ;;  %p1212_p2 = scmp.lt.s32.totalorder %s271_s13, %s271_s13 }
  0x2c   : > { %p1205_p9 = scmp.ne.s32.totalorder %s271_s13, %s1204_s23  ;;  %p1213_p6 = scmp.lt.s32.totalorder %s1204_s23, %s1204_s23 }
  0x2e   : > { %p1207_p10 = pnand %p1205_p9, %p2046_p13  ;;  %p1214_p4 = por %p1213_p6, %p1212_p2 }
  0x30   : > { %p1208_p1 = pneg %p1207_p10 }
  0x32   : > { %p1215_p8 = pnand %p1214_p4, %p1208_p1 }
  0x34   : > { %1218 = shalt.err (!%p1215_p8)
}
  0x35   : > { %s2038_s12 = smov 64   ;;  %s2039_s16 = smov 4  }
  0x36   : > { %1091 = dma.hbm_to_vmem [thread:$0]  (!%p1614_p11), %s2067_s1, 256, %s271_s13, [#allocation6], %s2038_s12, %s2038_s12, %s2039_s16  }
  0x37   : > { %p45_p1 = scmp.ge.s32.totalorder %s43_s15, 2  ;;  %s52_s19 = sadd.s32 1, %s1475_s26 }
  0x38   : > { %p59_p2 = scmp.ne.s32.totalorder %s1475_s26, %s1471_s25  ;;  %p60_p4 = scmp.eq.s32.totalorder %s1487_s29, 0 }
  0x39   : > { %s2104_s15 = smov (%p45_p1, %s43_s15), 0  ;;  %p2069_p8 = scmp.eq.s32.totalorder %s1584_s30, 1 }
  0x3a   : > { %2068 = sst [smem:[#allocation24_spill]] %s2104_s15  ;;  %p61_p6 = por %p60_p4, %p59_p2 }
  0x3b   : > { %p1652_p10 = por %p2069_p8, %p59_p2  ;;  %s47_s21 = ssub.s32 %s1483_s28, %s2104_s15 }
  0x3c   : > { %p1117_p12 = scmp.lt.s32.totalorder %s1487_s29, 2  ;;  %p50_p0 = scmp.eq.s32.totalorder %s47_s21, 0 }
  0x3d   : > { %s2070_s20 = scalar_select %p1652_p10, 1, 0 }
  0x3e   : > { %s1660_s22 = sand.u32 1, %s1475_s26   ;;  %p1662_p3 = pnand %p1117_p12, %p61_p6 }
  0x3f   : > { %s316_s23 = sand.u32 1, %s1487_s29   ;;  %s2045_s18 = sshll.u32 %s1660_s22, 3 }
  0x40   : > { %s2071_s13 = scalar_select %p1662_p3, 1, 0 }
  0x41   : > { %s1668_s17 = scalar_select %p50_p0, %s1475_s26, %s52_s19  }
  0x42   : > { %s999_s8 = sshll.u32 %s1483_s28, 7  ;;  %s2073_s3 = sld [smem:[#allocation27_spill]] }
  0x43   : > { %2072 = sst [smem:[#allocation25_spill]] %s1668_s17  ;;  %s320_s21 = scalar_lea.vmem [#allocation8], %s2045_s18 }
  0x44   : > { %s328_s15 = sshll.u32 %s320_s21, 4  ;;  %s1684_s19 = scalar_lea.hbm %s2030_s4, %s999_s8  ;;  %s1679_s15 = int_to_ptr.vmem [resolvable:$true] %s328_s15 }
  0x45   : > { %s1686_s17 = scalar_lea.sflag [#allocation9], %s316_s23  ;;  %p1692_p7 = pneg %p1662_p3 }
  0x47   : > { %s2074_s12 = scalar_select %p1692_p7, 1, 0 }
  0x48   : > { %s1675_s1 = scalar_lea.hbm %s2073_s3, %s999_s8  ;;  %s1224_s18 = scalar_lea.hbm %s2073_s3, 256 }
  0x49   : > { %s1219_s26 = scalar_lea.hbm %s1675_s1, 128  ;;  %p1225_p2 = scmp.lt.u32.totalorder %s1675_s1, %s2073_s3 }
  0x4a   : > { %p1220_p5 = scmp.ne.s32.totalorder %s1675_s1, %s1219_s26  ;;  %p1226_p4 = scmp.lt.u32.totalorder %s1224_s18, %s1219_s26 }
  0x4b   : > { %p1228_p8 = scmp.lt.u32.totalorder %s1219_s26, %s1675_s1 }
  0x4c   : > { %p1222_p9 = pnand %p1692_p7, %p1220_p5  ;;  %p1227_p6 = por %p1226_p4, %p1225_p2 }
  0x4e   : > { %p1223_p1 = pneg %p1222_p9  ;;  %p1229_p12 = por %p1228_p8, %p1227_p6 }
  0x50   : > { %p1230_p0 = pnand %p1229_p12, %p1223_p1 }
  0x52   : > { %1233 = shalt.err (!%p1230_p0)
}
  0x53   : > { %s1234_s10 = scalar_lea.vmem %s1679_s15, 128  ;;  %s1492_s23 = smov [#allocation8]  }
  0x54   : > { %p1235_p5 = scmp.ne.s32.totalorder %s1679_s15, %s1234_s10  ;;  %s1239_s16 = sshll.u32 %s1492_s23, 4  ;;  %s1240_s16 = int_to_ptr.vmem [resolvable:$false] %s1239_s16 }
  0x55   : > { %s1241_s21 = scalar_lea.vmem %s1240_s16, 256  ;;  %p1242_p10 = scmp.lt.s32.totalorder %s1679_s15, %s1240_s16 }
  0x56   : > { %p1237_p9 = pnand %p1235_p5, %p1692_p7  ;;  %p1243_p11 = scmp.lt.s32.totalorder %s1241_s21, %s1234_s10 }
  0x58   : > { %p1238_p13 = pneg %p1237_p9  ;;  %p1244_p2 = por %p1243_p11, %p1242_p10 }
  0x5a   : > { %p1245_p4 = pnand %p1244_p2, %p1238_p13 }
  0x5c   : > { %1248 = shalt.err (!%p1245_p4)
}
  0x5d   : > { %1101 = dma.hbm_to_vmem [thread:$0]  (!%p1662_p3), %s1675_s1, 128, %s1679_s15, %s1686_s17  }
  0x5e   : > { %s1493_s26 = smov [#allocation7]   ;;  %s996_s29 = sshll.u32 %s1660_s22, 2 }
  0x5f   : > { %s283_s18 = sshll.u32 %s1493_s26, 4  ;;  %s1249_s16 = scalar_lea.hbm %s2028_s2, 256  ;;  %s284_s18 = int_to_ptr.vmem [resolvable:$true] %s283_s18 }
  0x60   : > { %p1250_p11 = scmp.ne.s32.totalorder %s2028_s2, %s1249_s16  ;;  %p2075_p13 = scmp.ne.s32.totalorder %s2066_s14, 0 }
  0x61   : > { %p1256_p8 = scmp.lt.u32.totalorder %s1249_s16, %s2028_s2 }
  0x62   : > { %p2076_p10 = pneg %p2075_p13 }
  0x64   : > { %p1252_p1 = pnand %p1250_p11, %p2076_p10 }
  0x66   : > { %p1253_p6 = pneg %p1252_p1 }
  0x68   : > { %p1258_p12 = pnand %p1256_p8, %p1253_p6 }
  0x6a   : > { %1261 = shalt.err (!%p1258_p12)
}
  0x6b   : > { %s1262_s1 = scalar_lea.vmem %s284_s18, 256  ;;  %p2077_p5 = pmov %p2076_p10 }
  0x6c   : > { %p1263_p0 = scmp.ne.s32.totalorder %s284_s18, %s1262_s1  ;;  %p1270_p4 = scmp.lt.s32.totalorder %s284_s18, %s284_s18 }
  0x6d   : > { %p1271_p3 = scmp.lt.s32.totalorder %s1262_s1, %s1262_s1 }
  0x6e   : > { %p1265_p9 = pnand %p1263_p0, %p2077_p5 }
  0x6f   : > { %p1272_p7 = por %p1271_p3, %p1270_p4 }
  0x70   : > { %p1266_p2 = pneg %p1265_p9 }
  0x72   : > { %p1273_p10 = pnand %p1272_p7, %p1266_p2 }
  0x74   : > { %1276 = shalt.err (!%p1273_p10)
}
  0x75   : > { %s2078_s15 = smov 4   ;;  %s2079_s26 = smov 64  }
  0x76   : > { %1094 = dma.hbm_to_vmem [thread:$0]  (!%p2075_p13), %s2028_s2, 256, %s284_s18, [#allocation6], %s2079_s26, %s2079_s26, %s2078_s15  }
  0x77   : > { %s997_s8 = sshll.u32 %s1483_s28, 6  ;;  %s301_s23 = scalar_lea.vmem [#allocation2], %s996_s29 }
  0x78   : > { %s309_s16 = sshll.u32 %s301_s23, 4  ;;  %s1744_s1 = scalar_lea.hbm %s2026_s0, %s997_s8  ;;  %s310_s16 = int_to_ptr.vmem [resolvable:$true] %s309_s16 }
  0x79   : > { %s298_s14 = scalar_lea.sflag [#allocation3], %s1660_s22  ;;  %s1277_s7 = scalar_lea.hbm %s1744_s1, 64 }
  0x7a   : > { %p1278_p3 = scmp.ne.s32.totalorder %s1744_s1, %s1277_s7  ;;  %p2080_p7 = scmp.ne.s32.totalorder %s2074_s12, 0 }
  0x7b   : > { %s1282_s29 = scalar_lea.hbm %s2026_s0, 128  ;;  %p1283_p13 = scmp.lt.u32.totalorder %s1744_s1, %s2026_s0 }
  0x7c   : > { %p1280_p11 = pnand %p1278_p3, %p2080_p7  ;;  %p1284_p6 = scmp.lt.u32.totalorder %s1282_s29, %s1277_s7 }
  0x7d   : > { %p1286_p12 = scmp.lt.u32.totalorder %s1277_s7, %s1744_s1 }
  0x7e   : > { %p1281_p1 = pneg %p1280_p11  ;;  %p1285_p8 = por %p1284_p6, %p1283_p13 }
  0x80   : > { %p1287_p0 = por %p1286_p12, %p1285_p8 }
  0x82   : > { %p1288_p5 = pnand %p1287_p0, %p1281_p1 }
  0x84   : > { %1291 = shalt.err (!%p1288_p5)
}
  0x85   : > { %s1292_s24 = scalar_lea.vmem %s310_s16, 64  ;;  %s1494_s8 = smov [#allocation2]  }
  0x86   : > { %p1293_p9 = scmp.ne.s32.totalorder %s310_s16, %s1292_s24  ;;  %s1297_s23 = sshll.u32 %s1494_s8, 4  ;;  %s1298_s23 = int_to_ptr.vmem [resolvable:$false] %s1297_s23 }
  0x87   : > { %s1299_s10 = scalar_lea.vmem %s1298_s23, 128  ;;  %p1300_p10 = scmp.lt.s32.totalorder %s310_s16, %s1298_s23 }
  0x88   : > { %p1295_p2 = pnand %p1293_p9, %p2080_p7  ;;  %p1301_p3 = scmp.lt.s32.totalorder %s1299_s10, %s1292_s24 }
  0x8a   : > { %p1296_p4 = pneg %p1295_p2  ;;  %p1302_p11 = por %p1301_p3, %p1300_p10 }
  0x8c   : > { %p1303_p6 = pnand %p1302_p11, %p1296_p4 }
  0x8e   : > { %1306 = shalt.err (!%p1303_p6)
}
  0x8f   : > { %p2081_p13 = scmp.ne.s32.totalorder %s2071_s13, 0  ;;  %s2082_s7 = sshll.u32 %s1660_s22, 3 }
  0x90   : > { %s339_s21 = scalar_lea.vmem [#allocation10], %s2082_s7  ;;  %s1307_s15 = scalar_lea.hbm %s1684_s19, 128 }
  0x91   : > { %1098 = dma.hbm_to_vmem [thread:$0]  (!%p2081_p13), %s1744_s1, 64, %s310_s16, %s298_s14  }
  0x92   : > { %s347_s18 = sshll.u32 %s339_s21, 4  ;;  %p1308_p1 = scmp.ne.s32.totalorder %s1684_s19, %s1307_s15  ;;  %s348_s18 = int_to_ptr.vmem [resolvable:$true] %s347_s18 }
  0x93   : > { %s1312_s3 = scalar_lea.hbm %s2030_s4, 256  ;;  %p1313_p0 = scmp.lt.u32.totalorder %s1684_s19, %s2030_s4 }
  0x94   : > { %p1310_p8 = pnand %p1308_p1, %p2080_p7  ;;  %p1314_p5 = scmp.lt.u32.totalorder %s1312_s3, %s1307_s15 }
  0x95   : > { %p1316_p2 = scmp.lt.u32.totalorder %s1307_s15, %s1684_s19 }
  0x96   : > { %p1311_p12 = pneg %p1310_p8  ;;  %p1315_p9 = por %p1314_p5, %p1313_p0 }
  0x98   : > { %p1317_p4 = por %p1316_p2, %p1315_p9 }
  0x9a   : > { %p1318_p10 = pnand %p1317_p4, %p1311_p12 }
  0x9c   : > { %1321 = shalt.err (!%p1318_p10)
}
  0x9d   : > { %s1322_s22 = scalar_lea.vmem %s348_s18, 128  ;;  %s1495_s16 = smov [#allocation10]  }
  0x9e   : > { %p1323_p3 = scmp.ne.s32.totalorder %s348_s18, %s1322_s22  ;;  %s1327_s1 = sshll.u32 %s1495_s16, 4  ;;  %s1328_s1 = int_to_ptr.vmem [resolvable:$false] %s1327_s1 }
  0x9f   : > { %s1329_s14 = scalar_lea.vmem %s1328_s1, 256  ;;  %p1330_p1 = scmp.lt.s32.totalorder %s348_s18, %s1328_s1 }
  0xa0   : > { %p1325_p11 = pnand %p1323_p3, %p2080_p7  ;;  %p1331_p8 = scmp.lt.s32.totalorder %s1329_s14, %s1322_s22 }
  0xa2   : > { %p1326_p6 = pneg %p1325_p11  ;;  %p1332_p13 = por %p1331_p8, %p1330_p1 }
  0xa4   : > { %p1333_p0 = pnand %p1332_p13, %p1326_p6 }
  0xa6   : > { %1336 = shalt.err (!%p1333_p0)
}
  0xa7   : > { %p2083_p5 = scmp.ne.s32.totalorder %s2071_s13, 0  ;;  %p2084_p12 = scmp.ne.s32.totalorder %s2065_s11, 0 }
  0xa8   : > { %s1787_s12 = sand.u32 (!%p2084_p12), 1, %s1471_s25   ;;  %p2085_p7 = scmp.ne.s32.totalorder (!%p2084_p12), %s2062_s9, 0 }
  0xa9   : > { %1104 = dma.hbm_to_vmem [thread:$0]  (!%p2083_p5), %s1684_s19, 128, %s348_s18, %s1686_s17  }
  0xaa   : > { %356 = sbr.rel (%p2084_p12) target bundleno = 841 (0x349), region = 40  ;;  %s1003_s23 = sshll.u32 (!%p2084_p12), %s1787_s12, 2 }
  0xab   : > { %s359_s10 = scalar_lea.sflag (!%p2084_p12), [#allocation3], %s1787_s12  ;;  %s1791_s7 = scalar_lea.vmem (!%p2084_p12), [#allocation2], %s1003_s23 }
  0xb1   : > { %1446 = dma.done.wait (%p2085_p7), %s359_s10, 64  }
  0xb2   : > { %1448 = vsyncadd (%p2085_p7), %s359_s10, 4294967232  ;;  %p2086_p13 = scmp.eq.s32.totalorder %s1584_s30, 0 }
  0xb4   : > { %1450 = dma.done.wait (%p2086_p13), [#allocation6], 512   ;;  %p2087_p9 = pmov %p2086_p13 }
  0xb5   : > { %s375_s11 = sand.u32 1, %s1584_s30   ;;  %s1803_s13 = sshll.u32 %s1787_s12, 3 }
  0xb6   : > { %1452 = vsyncadd (%p2087_p9), [#allocation6], 4294966784  ;;  %s376_s17 = scalar_lea.sflag [#allocation9], %s375_s11  ;;  %s379_s19 = scalar_lea.vmem [#allocation8], %s1803_s13 }
  0xb7   : > { %1454 = dma.done.wait (%p2085_p7), %s376_s17, 256  }
  0xb8   : > { %1456 = vsyncadd (%p2085_p7), %s376_s17, 4294967040  ;;  %v1496_v0 = vmov 0.0   ;;  %vm1497_vm0 = vmmov 0   ;;  %vm457_vm1 = vcmask 261120   ;;  %v1187_v1 = vld [vmem:[#allocation5] sm:$0xff]   ;;  %v1188_v2 = vld [vmem:[#allocation7] sm:$0xff]  }
  0xb9   : > { %1052 = vmatprep.subr.bf16.mxu0 %v1496_v0  ;;  %1060 = vmatprep.subr.bf16.mxu1 %v1496_v0  ;;  %v462_v3 = vsel %vm457_vm1, %v1187_v1, 0  ;;  %v522_v4 = vsel %vm457_vm1, %v1188_v2, 0  ;;  %v1189_v5 = vld [vmem:[#allocation5 + $0x8] sm:$0xff]   ;;  %v1190_v6 = vld [vmem:[#allocation7 + $0x8] sm:$0xff]   ;;  %s1498_s9 = smov 116   ;;  %s1499_s21 = smov 124  }
  0xba   : > { %1056 = vmatprep.mubr.msk.bf16.mxu0 %vm1497_vm0, %v1496_v0  ;;  %1064 = vmatprep.mubr.msk.bf16.mxu1 %vm1497_vm0, %v1496_v0  ;;  %v465_v7 = vsel %vm457_vm1, %v1189_v5, 0  ;;  %v525_v8 = vsel %vm457_vm1, %v1190_v6, 0  ;;  %v440_v9 = vld [vmem:[%s1791_s7] sm:$0xf]  ;;  %v441_v10 = vld [vmem:[%s379_s19] sm:$0xff]  ;;  %s1500_s18 = smov 108  }
  0xbb   : > { %1053 = vmatpush3.bf16.xpose.msra.mxu0 %v462_v3  ;;  %1061 = vmatpush3.bf16.xpose.msra.mxu1 %v522_v4  ;;  %s1501_s15 = smov 100   ;;  %s1502_s29 = smov 16   ;;  %vm576_vm2 = vcmask 31744   ;;  %vm583_vm3 = vcmask 60416  }
  0xbc   : > { %1054 = vmatprep.subr.bf16.mxu0 %v1496_v0  ;;  %1062 = vmatprep.subr.bf16.mxu1 %v1496_v0  ;;  %s1503_s26 = smov 8   ;;  %s1504_s3 = smov 24  }
  0xbd   : > { %s388_s24 = scalar_lea.vmem [#allocation10], %s1803_s13  ;;  %s1505_s8 = smov 4  }
  0xbe   : > { %v1838_v25 = vld [vmem:[%s388_s24] sm:$0xff]  ;;  %s1506_s22 = smov 120   ;;  %s1507_s16 = smov 104  }
  0xbf   : > { %s1008_s1 = sshll.u32 %s1787_s12, 4  ;;  %s1508_s14 = smov 112  }
  0xc0   : > { %s1867_s23 = scalar_lea.vmem [#allocation11], %s1008_s1  ;;  %s431_s10 = scalar_lea.vmem [#allocation12], %s1803_s13 }
  0xc1   : > { %s760_s7 = sshll.u32 %s431_s10, 4  ;;  %s1044_s17 = sshll.u32 %s1479_s27, 7  ;;  %s1877_s7 = int_to_ptr.vmem [resolvable:$true] %s760_s7 }
  0xc2   : > { %s743_s19 = sshll.u32 %s1867_s23, 4  ;;  %p2088_p4 = scmp.ne.s32.totalorder %s2070_s20, 0  ;;  %s1889_s19 = int_to_ptr.vmem [resolvable:$true] %s743_s19 }
  0xc3   : > { %1055 = vmatpush3.bf16.xpose.msra.mxu0 %v465_v7  ;;  %1063 = vmatpush3.bf16.xpose.msra.mxu1 %v525_v8 }
  0xca   : > { %1057 = vmatmul.mubr.msk.bf16.vlgmr.msra.gmra.mrb[0].mxu0 %vm457_vm1, %v440_v9  ;;  %1065 = vmatmul.mubr.msk.bf16.vlgmr.msra.gmra.mrb[0].mxu1 %vm457_vm1, %v440_v9 }
 0x19d   : > { %v1819_v11 = vpop.f32.mrb[0].mxu0  ;;  %v1824_v13 = vpop.f32.mrb[0].mxu1 }
 0x19e   : > { %616 = vrot.lane.b32.xlu1 %v1819_v11, %s1498_s9  ;;  %588 = vrot.lane.b32.xlu0 %v1819_v11, %s1499_s21  ;;  %v1058_v12 = vpop.f32.mrb[1].mxu0  ;;  %v1827_v14 = vmul.f32 %v1819_v11, %v441_v10  ;;  %v1066_v16 = vpop.f32.mrb[1].mxu1  ;;  %v1830_v17 = vmul.f32 %v1824_v13, %v441_v10  ;;  %v567_v19 = vsub.f32 0.0, %v1819_v11  ;;  %v667_v22 = vsub.f32 0.0, %v1824_v13 }
 0x19f   : > { %v504_v15 = vpop.f32.mrb[2].mxu0  ;;  %v564_v20 = vpop.f32.mrb[2].mxu1  ;;  %v1041_v0 = vpack.c.bf16 %v1824_v13, %v1824_v13 }
 0x1a0   : > { %v1059_v18 = vpop.f32.mrb[3].mxu0  ;;  %v1067_v21 = vpop.f32.mrb[3].mxu1 }
 0x1a2   : > { %643 = vrot.lane.b32.xlu1 %v1819_v11, %s1500_s18  ;;  %585 = vrot.lane.b32.xlu0 %v567_v19, %s1498_s9 }
 0x1a6   : > { %613 = vrot.lane.b32.xlu1 %v567_v19, %s1500_s18  ;;  %640 = vrot.lane.b32.xlu0 %v567_v19, %s1501_s15  ;;  %s1886_s18 = scalar_lea.hbm %s2032_s6, %s1044_s17  ;;  %s1043_s15 = sshll.u32 %s1479_s27, 8 }
 0x1aa   : > { %693 = vrot.lane.b32.xlu1 %v1824_v13, %s1499_s21  ;;  %690 = vrot.lane.b32.xlu0 %v667_v22, %s1498_s9 }
 0x1ae   : > { %620 = vrot.lane.b32.xlu1 %v441_v10, %s1502_s29  ;;  %593 = vrot.lane.b32.xlu0 %v441_v10, %s1503_s26 }
 0x1b2   : > { %647 = vrot.lane.b32.xlu0 %v441_v10, %s1504_s3 }
 0x210   : > { %v617_v23 = vpop.permute.xlu1 %616  ;;  %v589_v24 = vpop.permute.xlu0 %588 }
 0x214   : > { %v644_v26 = vpop.permute.xlu1 %643  ;;  %v586_v27 = vpop.permute.xlu0 %585 }
 0x215   : > { %v591_v28 = vsel %vm576_vm2, %v586_v27, %v589_v24 }
 0x216   : > { %v597_v29 = vmul.f32 %v591_v28, %v1838_v25 }
 0x218   : > { %v614_v30 = vpop.permute.xlu1 %613  ;;  %599 = vrot.lane.b32.xlu1 %v597_v29, %s1503_s26  ;;  %v641_v31 = vpop.permute.xlu0 %640 }
 0x219   : > { %v619_v32 = vsel %vm576_vm2, %v614_v30, %v617_v23  ;;  %v646_v33 = vsel %vm576_vm2, %v641_v31, %v644_v26 }
 0x21a   : > { %v624_v34 = vmul.f32 %v619_v32, %v1838_v25  ;;  %v651_v35 = vmul.f32 %v646_v33, %v1838_v25 }
 0x21c   : > { %v694_v36 = vpop.permute.xlu1 %693  ;;  %626 = vrot.lane.b32.xlu0 %v624_v34, %s1502_s29  ;;  %653 = vrot.lane.b32.xlu1 %v651_v35, %s1504_s3  ;;  %v691_v37 = vpop.permute.xlu0 %690  ;;  %s1894_s29 = scalar_lea.sflag [#allocation13], %s375_s11  ;;  %s1509_s3 = smov [#allocation12]  }
 0x21d   : > { %v696_v38 = vsel %vm576_vm2, %v691_v37, %v694_v36  ;;  %s1341_s24 = sshll.u32 %s1509_s3, 4  ;;  %s1342_s24 = int_to_ptr.vmem [resolvable:$false] %s1341_s24 }
 0x21e   : > { %v698_v39 = vmul.f32 %v696_v38, %v1838_v25  ;;  %p1344_p11 = scmp.lt.s32.totalorder %s1877_s7, %s1342_s24 }
 0x220   : > { %569 = vrot.lane.b32.xlu1 %v567_v19, %s1499_s21  ;;  %700 = vrot.lane.b32.xlu0 %v698_v39, %s1503_s26  ;;  %v594_v40 = vpop.permute.xlu0 %593  ;;  %v621_v41 = vpop.permute.xlu1 %620  ;;  %s1337_s26 = scalar_lea.vmem %s1877_s7, 128 }
 0x221   : > { %v596_v42 = vmul.f32 %v594_v40, %v1819_v11  ;;  %v623_v50 = vmul.f32 %v621_v41, %v1819_v11  ;;  %v697_v53 = vmul.f32 %v594_v40, %v1824_v13  ;;  %p1338_p2 = scmp.ne.s32.totalorder %s1877_s7, %s1337_s26 }
 0x223   : > { %p1339_p10 = pnand %p1338_p2, %p2088_p4 }
 0x224   : > { %669 = vrot.lane.b32.xlu1 %v667_v22, %s1499_s21  ;;  %573 = vrot.lane.b32.xlu0 %v1819_v11, %s1505_s8  ;;  %v648_v43 = vpop.permute.xlu0 %647 }
 0x225   : > { %v650_v46 = vmul.f32 %v648_v43, %v1819_v11  ;;  %p1340_p3 = pneg %p1339_p10 }
 0x228   : > { %673 = vrot.lane.b32.xlu0 %v1824_v13, %s1505_s8 }
 0x28a   : > { %v600_v44 = vpop.permute.xlu1 %599 }
 0x28b   : > { %v602_v45 = vadd.f32 %v600_v44, %v596_v42 }
 0x28d   : > { %v603_v47 = vmul.f32 0.35355338, %v602_v45 }
 0x28e   : > { %v654_v48 = vpop.permute.xlu1 %653  ;;  %v627_v49 = vpop.permute.xlu0 %626 }
 0x28f   : > { %v1038_v51 = vpack.c.bf16 %v603_v47, %v603_v47  ;;  %v656_v52 = vadd.f32 %v654_v48, %v650_v46  ;;  %v629_v55 = vadd.f32 %v627_v49, %v623_v50 }
 0x291   : > { %v657_v54 = vmul.f32 0.35355338, %v656_v52  ;;  %608 = vrot.lane.b32.xlu0 %v1038_v51, %s1506_s22  ;;  %v630_v60 = vmul.f32 0.35355338, %v629_v55 }
 0x292   : > { %v701_v56 = vpop.permute.xlu0 %700  ;;  %v570_v59 = vpop.permute.xlu1 %569 }
 0x293   : > { %v1040_v57 = vpack.c.bf16 %v657_v54, %v657_v54  ;;  %v703_v58 = vadd.f32 %v701_v56, %v697_v53  ;;  %v1039_v2 = vpack.c.bf16 %v630_v60, %v630_v60 }
 0x295   : > { %v1042_v61 = vpack.c.bf16 %v703_v58, %v703_v58  ;;  %662 = vrot.lane.b32.xlu0 %v1040_v57, %s1507_s16 }
 0x296   : > { %v574_v62 = vpop.permute.xlu0 %573  ;;  %v670_v3 = vpop.permute.xlu1 %669 }
 0x297   : > { %v577_v63 = vsel %vm576_vm2, %v570_v59, %v574_v62  ;;  %708 = vrot.lane.b32.xlu1 %v1042_v61, %s1506_s22  ;;  %s1343_s22 = scalar_lea.vmem %s1342_s24, 256 }
 0x298   : > { %v579_v1 = vmul.f32 %v577_v63, %v1838_v25  ;;  %p1345_p6 = scmp.lt.s32.totalorder %s1343_s22, %s1337_s26 }
 0x299   : > { %713 = vrot.lane.b32.xlu0 %v1041_v0, %s1507_s16 }
 0x29a   : > { %v580_v4 = vadd.f32 %v579_v1, %v1827_v14  ;;  %v674_v5 = vpop.permute.xlu0 %673  ;;  %p1346_p1 = por %p1345_p6, %p1344_p11 }
 0x29b   : > { %v676_v6 = vsel %vm576_vm2, %v670_v3, %v674_v5  ;;  %635 = vrot.lane.b32.xlu1 %v1039_v2, %s1508_s14 }
 0x29c   : > { %v581_v7 = vmul.f32 0.35355338, %v580_v4  ;;  %v678_v8 = vmul.f32 %v676_v6, %v1838_v25  ;;  %p1347_p8 = pnand %p1346_p1, %p1340_p3 }
 0x29e   : > { %v582_v9 = vpack.c.bf16 %v581_v7, %v581_v7  ;;  %v679_v10 = vadd.f32 %v678_v8, %v1830_v17 }
 0x29f   : > { %686 = vrot.lane.b32.xlu1 %v1041_v0, %s1508_s14 }
 0x2a0   : > { %v680_v11 = vpack.c.bf16 %v679_v10, %v679_v10  ;;  %584 = vst.msk [vmem:[%s1867_s23] sm:$0xf] %vm583_vm3, %v582_v9 }
 0x2a2   : > { %681 = vst.msk [vmem:[%s431_s10] sm:$0xf] %vm583_vm3, %v680_v11 }
 0x303   : > { %v609_v12 = vpop.permute.xlu0 %608 }
 0x304   : > { %1018 = vst.msk [vmem:[%s1867_s23 + $0x4] sm:$0xf] %vm583_vm3, %v609_v12 }
 0x307   : > { %v663_v13 = vpop.permute.xlu0 %662 }
 0x308   : > { %1022 = vst.msk [vmem:[%s1867_s23 + $0xc] sm:$0xf] %vm583_vm3, %v663_v13 }
 0x309   : > { %v709_v14 = vpop.permute.xlu1 %708 }
 0x30a   : > { %1025 = vst.msk [vmem:[%s431_s10 + $0x4] sm:$0xf] %vm583_vm3, %v709_v14 }
 0x30b   : > { %v714_v15 = vpop.permute.xlu0 %713 }
 0x30c   : > { %1350 = shalt.err (!%p1347_p8)
}
 0x30d   : > { %s1351_s30 = scalar_lea.hbm %s1886_s18, 128  ;;  %s1355_s1 = scalar_lea.hbm %s2032_s6, 256 }
 0x30e   : > { %p1352_p0 = scmp.ne.s32.totalorder %s1886_s18, %s1351_s30  ;;  %p1356_p7 = scmp.lt.u32.totalorder %s1886_s18, %s2032_s6 }
 0x30f   : > { %p1357_p13 = scmp.lt.u32.totalorder %s1355_s1, %s1351_s30  ;;  %p1359_p2 = scmp.lt.u32.totalorder %s1351_s30, %s1886_s18 }
 0x310   : > { %p1353_p5 = pnand %p1352_p0, %p2088_p4 }
 0x311   : > { %p1358_p9 = por %p1357_p13, %p1356_p7 }
 0x312   : > { %p1354_p12 = pneg %p1353_p5 }
 0x313   : > { %p1360_p10 = por %p1359_p2, %p1358_p9 }
 0x315   : > { %p1361_p3 = pnand %p1360_p10, %p1354_p12 }
 0x317   : > { %1364 = shalt.err (!%p1361_p3)
}
 0x318   : > { %s1510_s9 = smov 64   ;;  %s1922_s21 = scalar_lea.vmem [#allocation14], %s1803_s13  ;;  %v636_v16 = vpop.permute.xlu1 %635 }
 0x319   : > { %1083 = dma.vmem_to_hbm [thread:$0]  (%p2088_p4), %s1877_s7, 128, %s1886_s18, %s1894_s29, %s1510_s9, %s1510_s9, %s1505_s8  }
 0x31a   : > { %1026 = vst.msk [vmem:[%s1922_s21 + $0x4] sm:$0xf] %vm583_vm3, %v714_v15  ;;  %s1931_s24 = scalar_lea.hbm %s2031_s5, %s1043_s15  ;;  %s777_s22 = sshll.u32 %s1922_s21, 4  ;;  %1020 = vst.msk [vmem:[%s1867_s23 + $0x8] sm:$0xf] %vm583_vm3, %v636_v16  ;;  %s1965_s22 = int_to_ptr.vmem [resolvable:$true] %s777_s22 }
 0x31b   : > { %s719_s30 = scalar_lea.sflag [#allocation4], %s1787_s12  ;;  %s1365_s11 = scalar_lea.vmem %s1889_s19, 256 }
 0x31c   : > { %p1366_p11 = scmp.ne.s32.totalorder %s1889_s19, %s1365_s11  ;;  %s1511_s13 = smov [#allocation11]  }
 0x31d   : > { %s1369_s7 = sshll.u32 %s1511_s13, 4  ;;  %s1370_s7 = int_to_ptr.vmem [resolvable:$false] %s1369_s7 }
 0x31e   : > { %p1367_p6 = pnand %p1366_p11, %p2088_p4  ;;  %s1371_s18 = scalar_lea.vmem %s1370_s7, 512 }
 0x31f   : > { %p1372_p8 = scmp.lt.s32.totalorder %s1889_s19, %s1370_s7  ;;  %p1373_p0 = scmp.lt.s32.totalorder %s1371_s18, %s1365_s11 }
 0x320   : > { %p1368_p1 = pneg %p1367_p6 }
 0x321   : > { %p1374_p5 = por %p1373_p0, %p1372_p8 }
 0x323   : > { %p1375_p12 = pnand %p1374_p5, %p1368_p1 }
 0x325   : > { %1378 = shalt.err (!%p1375_p12)
}
 0x326   : > { %s1379_s23 = scalar_lea.hbm %s1931_s24, 256  ;;  %s1383_s1 = scalar_lea.hbm %s2031_s5, 512 }
 0x327   : > { %p1380_p7 = scmp.ne.s32.totalorder %s1931_s24, %s1379_s23  ;;  %p1384_p2 = scmp.lt.u32.totalorder %s1931_s24, %s2031_s5 }
 0x328   : > { %p1385_p10 = scmp.lt.u32.totalorder %s1383_s1, %s1379_s23  ;;  %p1387_p11 = scmp.lt.u32.totalorder %s1379_s23, %s1931_s24 }
 0x329   : > { %p1381_p13 = pnand %p1380_p7, %p2088_p4 }
 0x32a   : > { %p1386_p3 = por %p1385_p10, %p1384_p2 }
 0x32b   : > { %p1382_p9 = pneg %p1381_p13 }
 0x32c   : > { %p1388_p6 = por %p1387_p11, %p1386_p3 }
 0x32e   : > { %p1389_p1 = pnand %p1388_p6, %p1382_p9 }
 0x330   : > { %1392 = shalt.err (!%p1389_p1)
}
 0x331   : > { %1082 = dma.vmem_to_hbm [thread:$0]  (%p2088_p4), %s1889_s19, 256, %s1931_s24, %s719_s30, %s1510_s9, %s1510_s9, %s1505_s8   ;;  %v687_v17 = vpop.permute.xlu1 %686 }
 0x332   : > { %s2089_s11 = sld [smem:[#allocation28_spill]]  ;;  %689 = vst.msk [vmem:[%s1922_s21] sm:$0xf] %vm583_vm3, %v687_v17  ;;  %s1393_s12 = scalar_lea.vmem %s1965_s22, 128 }
 0x333   : > { %p1394_p8 = scmp.ne.s32.totalorder %s1965_s22, %s1393_s12  ;;  %s1512_s19 = smov [#allocation14]  }
 0x334   : > { %s1397_s24 = sshll.u32 %s1512_s19, 4  ;;  %s1398_s24 = int_to_ptr.vmem [resolvable:$false] %s1397_s24 }
 0x335   : > { %p1395_p0 = pnand %p1394_p8, %p2088_p4  ;;  %s1399_s27 = scalar_lea.vmem %s1398_s24, 256 }
 0x336   : > { %p1400_p12 = scmp.lt.s32.totalorder %s1965_s22, %s1398_s24  ;;  %p1401_p7 = scmp.lt.s32.totalorder %s1399_s27, %s1393_s12 }
 0x337   : > { %p1396_p5 = pneg %p1395_p0 }
 0x338   : > { %s1972_s13 = scalar_lea.hbm %s2089_s11, %s1044_s17  ;;  %p1402_p13 = por %p1401_p7, %p1400_p12 }
 0x33a   : > { %p1403_p9 = pnand %p1402_p13, %p1396_p5 }
 0x33c   : > { %1406 = shalt.err (!%p1403_p9)
}
 0x33d   : > { %s1407_s17 = scalar_lea.hbm %s1972_s13, 128  ;;  %s1411_s7 = scalar_lea.hbm %s2089_s11, 256 }
 0x33e   : > { %p1408_p2 = scmp.ne.s32.totalorder %s1972_s13, %s1407_s17  ;;  %p1412_p11 = scmp.lt.u32.totalorder %s1972_s13, %s2089_s11 }
 0x33f   : > { %p1413_p6 = scmp.lt.u32.totalorder %s1411_s7, %s1407_s17  ;;  %p1415_p8 = scmp.lt.u32.totalorder %s1407_s17, %s1972_s13 }
 0x340   : > { %p1409_p10 = pnand %p1408_p2, %p2088_p4 }
 0x341   : > { %p1414_p1 = por %p1413_p6, %p1412_p11 }
 0x342   : > { %p1410_p3 = pneg %p1409_p10 }
 0x343   : > { %p1416_p0 = por %p1415_p8, %p1414_p1 }
 0x345   : > { %p1417_p5 = pnand %p1416_p0, %p1410_p3 }
 0x347   : > { %1420 = shalt.err (!%p1417_p5)
}
 0x348   : > { %1084 = dma.vmem_to_hbm [thread:$0]  (%p2088_p4), %s1965_s22, 128, %s1972_s13, %s1894_s29, %s1510_s9, %s1510_s9, %s1505_s8  }
 0x349 PF: > { %s2090_s15 = sld [smem:[#allocation20_spill]]  ;;  %s2091_s16 = sld [smem:[#allocation23_spill]] }
 0x34a   : > { %s2092_s1 = sld [smem:[#allocation22_spill]] }
 0x34f   : > { %s792_s14 = sand.u32 1, %s2090_s15   ;;  %p2093_p12 = scmp.ne.s32.totalorder %s2091_s16, 0 }
 0x350   : > { %p2094_p7 = scmp.ge.s32.totalorder %s2092_s1, 2  ;;  %s793_s10 = scalar_lea.sflag [#allocation4], %s792_s14 }
 0x352   : > { %p1106_p13 = pnand %p2094_p7, %p2093_p12 }
 0x354   : > { %1458 = dma.done.wait (!%p1106_p13), %s793_s10, 256  }
 0x355   : > { %1460 = vsyncadd (!%p1106_p13), %s793_s10, 4294967040  ;;  %s2095_s20 = sadd.s32 4294967294, %s2092_s1  }
 0x356   : > { %s801_s26 = sand.u32 1, %s2095_s20  }
 0x357   : > { %s802_s3 = scalar_lea.sflag [#allocation13], %s801_s26 }
 0x358   : > { %1462 = dma.done.wait (!%p1106_p13), %s802_s3, 256  }
 0x359   : > { %1464 = vsyncadd (!%p1106_p13), %s802_s3, 4294967040  ;;  %s31_s29 = sadd.s32 1, %s2092_s1   ;;  %s2096_s8 = sld [smem:[#allocation21_spill]] }
 0x35a   : > { %p28_p4 = scmp.ge.s32.totalorder %s31_s29, 4   ;;  %s2097_s26 = sld [smem:[#allocation25_spill]] }
 0x35b   : > { %s2098_s9 = sld [smem:[#allocation24_spill]]  ;;  %s2099_s24 = smov %s1471_s25 }
 0x35c   : > { %s2101_s27 = smov %s1483_s28  ;;  %30 = sbr.rel (!%p28_p4) target bundleno = 15 (0xf), region = 154 }
 0x35f   : > { %s2100_s25 = smov %s2096_s8 }
 0x361   : > { %s2102_s28 = smov %s2098_s9 }
 0x363   :  { %816 = vsyncpa [#allocation3], 1 }
 0x364   :  { %818 = vsyncpa [#allocation3 + $0x1], 1 }
 0x365   :  { %819 = vsyncpa [#allocation6], 1 }
 0x366   :  { %820 = vsyncpa [#allocation9], 1 }
 0x367   :  { %822 = vsyncpa [#allocation9 + $0x1], 1 }
 0x368   :  { %823 = vsyncpa [#allocation4], 1 }
 0x369   :  { %825 = vsyncpa [#allocation4 + $0x1], 1 }
 0x36a   :  { %826 = vsyncpa [#allocation13], 1 }
 0x36b   :  { %828 = vsyncpa [#allocation13 + $0x1], 1 }

</bundles_post_ra>
